<compile_context>
chip_gen: v5e
topology: v5e:2x2
jax: 0.10.0
libtpu: 0.0.40
codegen_flags: <defaults>
</compile_context>

<pallas_src>
import functools
import math

import jax
import jax.numpy as jnp
from jax.experimental import pallas as pl
from jax.experimental.pallas import tpu as pltpu


def _round_up(x: int, m: int) -> int:
    return ((x + m - 1) // m) * m


# ---------------------------------------------------------------------------
# Kernel: one (batch tile, out tile) block -> out = x @ W_t + b
# (W_t already ELU-transformed at parameter-preparation time.)
# ---------------------------------------------------------------------------
def _elu_linear_kernel(x_ref, w_ref, b_ref, o_ref, *, compute_dtype):
    x = x_ref[...].astype(compute_dtype)          # bf16 operand -> MXU fast path
    acc = jnp.dot(x, w_ref[...], preferred_element_type=jnp.float32)
    o_ref[...] = (acc + b_ref[...]).astype(o_ref.dtype)   # bias add in f32


# ---------------------------------------------------------------------------
# Parameter preparation (done ONCE, not per forward call)
# ---------------------------------------------------------------------------
def prepare_elu_linear_params(weights, bias, *, leak: float = 0.01,
                              weight_dtype=jnp.bfloat16, lane: int = 128):
    """Hoisted ELU transform + lane padding of the out dim.

    elu(w) + 1 - leak  ==  w + (1 - leak)            for w > 0
                       ==  expm1(w) + (1 - leak)     for w <= 0   (no inf, no cancellation)
    Zero-padded output columns are sliced off in the wrapper (bias padded with 0).
    """
    if leak < 0.0:
        raise ValueError("leak must be non-negative.")
    w = jnp.asarray(weights, jnp.float32)
    in_size, out_size = w.shape
    out_p = _round_up(out_size, lane)

    w_t = jnp.where(w > 0.0, w, jnp.expm1(jnp.minimum(w, 0.0))) + (1.0 - leak)
    w_t = jnp.pad(w_t, ((0, 0), (0, out_p - out_size))).astype(weight_dtype)

    if bias is None:
        b_p = jnp.zeros((1, out_p), jnp.float32)
    else:
        b = jnp.asarray(bias, jnp.float32).reshape(1, -1)
        b_p = jnp.pad(b, ((0, 0), (0, out_p - out_size)))
    return w_t, b_p


# ---------------------------------------------------------------------------
# Forward wrapper
# ---------------------------------------------------------------------------
def elu_linear_forward(x, w_t, b_p, out_size: int, *,
                       block_batch: int = 1024, block_out: int = 2048,
                       out_dtype=jnp.float32):
    """Apply ELULinear. Broadcasts like nn.Linear over leading dims of x."""
    x = jnp.asarray(x)
    lead_shape = x.shape[:-1]
    in_size = x.shape[-1]
    if w_t.shape[0] != in_size:
        raise ValueError(f"in_size mismatch: x has {in_size}, weight has {w_t.shape[0]}")
    out_p = w_t.shape[1]

    x2 = x.reshape(-1, in_size)          # no batch/K padding: ragged last block is OK
    batch = x2.shape[0]

    w_bytes = jnp.dtype(w_t.dtype).itemsize
    x_bytes = jnp.dtype(x2.dtype).itemsize
    o_bytes = jnp.dtype(out_dtype).itemsize
    b_bytes = jnp.dtype(b_p.dtype).itemsize

    # --- generation-aware VMEM budget (v7x: 64 MiB/TC, v5e/v6e: 128 MiB) ---
    try:
        vmem_cap = int(getattr(pltpu.get_tpu_info(), "vmem_capacity_bytes", 64 << 20))
    except Exception:
        vmem_cap = 64 << 20
    vmem_budget = int(vmem_cap * 0.8)

    # --- out-dim tile: multiple of 128 lanes; weight block capped at ~40% of budget
    #     (budget assumes the resident blocks may be double-buffered). ---
    max_tn = max(128, ((vmem_budget * 2 // 5) // max(1, 2 * in_size * w_bytes)) // 128 * 128)
    tn = min(out_p, _round_up(max(block_out, 128), 128), max_tn)
    n_tiles = pl.cdiv(out_p, tn)

    # --- batch tile: multiple of 8 sublanes; >=2 tiles when batch allows (v7x
    #     megacore); shrunk until the tile set fits the VMEM budget. ---
    if batch <= 8:
        tb = batch                                   # single block == full batch dim
    else:
        tb = _round_up(max(8, min(block_batch, batch)), 8)
        tb = min(tb, _round_up(pl.cdiv(batch, 2), 8))

    def _vmem_need(tb_):
        return (2 * in_size * tn * w_bytes           # weight block (assume 2 buffers)
                + 2 * tn * b_bytes                   # bias block
                + 2 * tb_ * in_size * x_bytes        # x tile, double-buffered
                + 2 * tb_ * tn * o_bytes)            # out tile, double-buffered

    while tb > 8 and _vmem_need(tb) + (2 << 20) > vmem_budget:
        tb = _round_up(tb // 2, 8)
    b_tiles = pl.cdiv(batch, tb)

    # N outer, batch inner -> each weight column block stays resident across the
    # inner batch loop; both axes are independent (no accumulation) -> parallel.
    grid = (n_tiles, b_tiles)

    kernel = functools.partial(_elu_linear_kernel, compute_dtype=w_t.dtype)

    cost = pl.CostEstimate(
        flops=2 * batch * in_size * out_p,
        transcendentals=0,                           # ELU transform hoisted out
        bytes_accessed=(n_tiles * batch * in_size * x_bytes
                        + in_size * out_p * w_bytes
                        + out_p * b_bytes
                        + batch * out_p * o_bytes),
    )

    vmem_limit = int(min(vmem_budget, max(_vmem_need(tb) + (4 << 20), 16 << 20)))

    out_padded = pl.pallas_call(
        kernel,
        out_shape=jax.ShapeDtypeStruct((batch, out_p), out_dtype),
        grid_spec=pltpu.PrefetchScalarGridSpec(
            num_scalar_prefetch=0,
            grid=grid,
            in_specs=[
                pl.BlockSpec((tb, in_size), lambda n, b: (b, 0)),   # x tile (full K)
                pl.BlockSpec((in_size, tn), lambda n, b: (0, n)),   # weight col block
                pl.BlockSpec((1, tn), lambda n, b: (0, n)),         # bias col block
            ],
            out_specs=pl.BlockSpec((tb, tn), lambda n, b: (b, n)),
        ),
        compiler_params=pltpu.CompilerParams(
            dimension_semantics=("parallel", "parallel"),
            vmem_limit_bytes=vmem_limit,
        ),
        cost_estimate=cost,
    )(x2, w_t, b_p)

    out = out_padded if out_p == out_size else out_padded[:, :out_size]
    return out.reshape(lead_shape + (out_size,))


# ---------------------------------------------------------------------------
# Pure-JAX references
# ---------------------------------------------------------------------------
def reference_elu_linear(x, weights, bias, *, leak: float = 0.01):
    w_t = jax.nn.elu(weights) + 1.0 - leak
    out = x @ w_t
    if bias is not None:
        out = out + bias
    return out


def reference_bf16(x, w_t_padded, bias, out_size):
    """Emulates the kernel's bf16-operand / f32-accumulate numerics."""
    xw = x.astype(jnp.bfloat16).astype(jnp.float32)
    wt = jnp.asarray(w_t_padded, jnp.float32)[:, :out_size]
    out = xw @ wt
    if bias is not None:
        out = out + bias
    return out


if __name__ == "__main__":
    key = jax.random.PRNGKey(0)

    # ---- config 1: bias path, 2 batch tiles (tb=8, batch=16) -----------------
    batch, in_size, out_size, leak = 16, 32, 8, 0.01
    key, kw, kb, kx = jax.random.split(key, 4)
    bound = math.sqrt(6.0 / in_size)
    weights = jax.random.uniform(kw, (in_size, out_size), jnp.float32, -bound, bound)
    bias = jax.random.uniform(kb, (out_size,), jnp.float32, -0.5, 0.5)
    x = jax.random.normal(kx, (batch, in_size), jnp.float32)

    w_t, b_p = prepare_elu_linear_params(weights, bias, leak=leak)
    out = jax.block_until_ready(
        elu_linear_forward(x, w_t, b_p, out_size, block_batch=8))

    ref_exact = reference_bf16(x, w_t, bias, out_size)          # kernel-numerics ref
    ref_f32 = reference_elu_linear(x, weights, bias, leak=leak)  # module-semantics ref
    assert out.shape == ref_f32.shape, (out.shape, ref_f32.shape)
    assert jnp.allclose(out, ref_exact, atol=1e-3, rtol=1e-3), \
        float(jnp.max(jnp.abs(out - ref_exact)))
    assert jnp.allclose(out, ref_f32, atol=1e-1, rtol=5e-2), \
        float(jnp.max(jnp.abs(out - ref_f32)))

    # ---- config 2: no bias, 3-D input, ragged batch (20 rows), 2 out tiles ----
    key, kw2, kx2 = jax.random.split(key, 3)
    in2, out2 = 32, 200                      # out_p = 256 -> 2 N tiles at block_out=128
    bound2 = math.sqrt(6.0 / in2)
    weights2 = jax.random.uniform(kw2, (in2, out2), jnp.float32, -bound2, bound2)
    x2 = jax.random.normal(kx2, (2, 10, in2), jnp.float32)      # flattens to 20 rows

    w_t2, b_p2 = prepare_elu_linear_params(weights2, None, leak=leak)
    out2v = jax.block_until_ready(
        elu_linear_forward(x2, w_t2, b_p2, out2, block_batch=8, block_out=128))

    ref2_exact = reference_bf16(x2, w_t2, None, out2)
    ref2_f32 = reference_elu_linear(x2, weights2, None, leak=leak)
    assert out2v.shape == ref2_f32.shape, (out2v.shape, ref2_f32.shape)
    assert jnp.allclose(out2v, ref2_exact, atol=1e-3, rtol=1e-3), \
        float(jnp.max(jnp.abs(out2v - ref2_exact)))
    assert jnp.allclose(out2v, ref2_f32, atol=1e-1, rtol=5e-2), \
        float(jnp.max(jnp.abs(out2v - ref2_f32)))

    print("KERNEL_OK")
</pallas_src>

<mosaic_0001>
module attributes {stable_mosaic.version = 11 : i64} {
  func.func @_elu_linear_kernel(%arg0: i32, %arg1: i32, %arg2: memref<8x32xf32, #tpu.memory_space<vmem>>, %arg3: memref<32x128xbf16, #tpu.memory_space<vmem>>, %arg4: memref<1x128xf32, #tpu.memory_space<vmem>>, %arg5: memref<8x128xf32, #tpu.memory_space<vmem>>) attributes {dimension_semantics = [#tpu.dimension_semantics<parallel>, #tpu.dimension_semantics<parallel>], iteration_bounds = array<i64: 1, 2>, scalar_prefetch = 0 : i64, scratch_operands = 0 : i64, tpu.core_type = #tpu.core_type<tc>, window_params = [{transform_indices = @transform_0, window_bounds = array<i64: 8, 32>}, {transform_indices = @transform_1, window_bounds = array<i64: 32, 128>}, {transform_indices = @transform_2, window_bounds = array<i64: 1, 128>}, {transform_indices = @transform_3, window_bounds = array<i64: 8, 128>}]} {
    %c0 = arith.constant 0 : index
    %c0_0 = arith.constant 0 : index
    %0 = vector.load %arg2[%c0, %c0_0] : memref<8x32xf32, #tpu.memory_space<vmem>>, vector<8x32xf32>
    %1 = arith.truncf %0 : vector<8x32xf32> to vector<8x32xbf16>
    %c0_1 = arith.constant 0 : index
    %c0_2 = arith.constant 0 : index
    %2 = vector.load %arg3[%c0_1, %c0_2] : memref<32x128xbf16, #tpu.memory_space<vmem>>, vector<32x128xbf16>
    %cst = arith.constant dense<0.000000e+00> : vector<8x128xf32>
    %3 = tpu.matmul %1, %2, %cst {dimension_numbers = #tpu.dot_dimension_numbers<[1], [0], [0], [1], [0, 0, 1, 1], [], []>} : vector<8x32xbf16>, vector<32x128xbf16>, vector<8x128xf32> -> vector<8x128xf32>
    %c0_3 = arith.constant 0 : index
    %c0_4 = arith.constant 0 : index
    %4 = vector.load %arg4[%c0_3, %c0_4] : memref<1x128xf32, #tpu.memory_space<vmem>>, vector<1x128xf32>
    %5 = vector.broadcast %4 : vector<1x128xf32> to vector<8x128xf32>
    %6 = arith.addf %3, %5 : vector<8x128xf32>
    %c0_5 = arith.constant 0 : index
    %c0_6 = arith.constant 0 : index
    %7 = vector.load %arg5[%c0_5, %c0_6] : memref<8x128xf32, #tpu.memory_space<vmem>>, vector<8x128xf32>
    tpu.vector_store %arg5[%c0_5, %c0_6], %6 {strides = array<i32>} : memref<8x128xf32, #tpu.memory_space<vmem>>, vector<8x128xf32>,
    return
  }
  func.func @transform_0(%arg0: i32, %arg1: i32) -> (i32, i32) {
    %c0_i32 = arith.constant 0 : i32
    %c0_i32_0 = arith.constant 0 : i32
    return %arg1, %c0_i32 : i32, i32
  }
  func.func @transform_1(%arg0: i32, %arg1: i32) -> (i32, i32) {
    %c0_i32 = arith.constant 0 : i32
    %c0_i32_0 = arith.constant 0 : i32
    return %c0_i32, %arg0 : i32, i32
  }
  func.func @transform_2(%arg0: i32, %arg1: i32) -> (i32, i32) {
    %c0_i32 = arith.constant 0 : i32
    %c0_i32_0 = arith.constant 0 : i32
    return %c0_i32, %arg0 : i32, i32
  }
  func.func @transform_3(%arg0: i32, %arg1: i32) -> (i32, i32) {
    %c0_i32 = arith.constant 0 : i32
    return %arg1, %arg0 : i32, i32
  }
}

</mosaic_0001>

<bundles_post_ra>
// kernel: tpu_custom_call.1
= control target key start
LH: loop header
LB: loop body
LE: loop exit
PB: predicated region body
PF: predicated region fallthrough
CT: control target
= control target key end

     0   :  { %8 = vsyncpa [#allocation3], 0  ;;  %s821_s0 = inlined_call_operand.hbm [shape: f32[16,32], index: 0, kind: input, shape index: {}]   ;;  %s822_s1 = inlined_call_operand.hbm [shape: bf16[32,128], index: 1, kind: input, shape index: {}]   ;;  %s823_s2 = inlined_call_operand.vmem [shape: f32[1,128], index: 2, kind: input, shape index: {}]   ;;  %s824_s3 = inlined_call_operand.hbm [shape: f32[16,128], index: 3, kind: output, shape index: {}]  }
   0x1   :  { %10 = vsyncpa [#allocation3 + $0x1], 0 }
   0x2   :  { %11 = vsyncpa [#allocation6], 0 }
   0x3   :  { %12 = vsyncpa [#allocation4], 0 }
   0x4   :  { %14 = vsyncpa [#allocation4 + $0x1], 0  ;;  %s675_s12 = smov 0   ;;  %s677_s13 = smov 0  }
   0x5   :  { %s679_s14 = smov 0   ;;  %s681_s15 = smov 0  }
   0x6   :  { %s683_s16 = smov 0   ;;  %s685_s17 = smov 0  }
   0x7 LB: > { %s401_s18 = sadd.s32 4294967295, %s650_s17   ;;  %p403_p0 = scmp.ge.s32.totalorder %s650_s17, 1  ;;  %s650_s17 = sphi %s685_s17, %s20_s17   ;;  %s646_s16 = sphi %s683_s16, %s835_s16   ;;  %s642_s15 = sphi %s681_s15, %s834_s15   ;;  %s638_s14 = sphi %s679_s14, %s833_s14   ;;  %s634_s13 = sphi %s677_s13, %s832_s13   ;;  %s630_s12 = sphi %s675_s12, %s831_s12  }
   0x8   : > { %p707_p1 = scmp.eq.s32.totalorder %s401_s18, 0  ;;  %p143_p2 = scmp.lt.s32.totalorder %s650_s17, 3 }
   0x9   : > { %s156_s22 = sshll.u32 %s822_s1, 4  ;;  %s652_s24 = smov [#allocation5]   ;;  %s157_s22 = int_to_ptr.hbm [resolvable:$true] %s156_s22 }
   0xa   : > { %p715_p3 = pnand %p403_p0, %p143_p2  ;;  %s158_s25 = sshll.u32 %s652_s24, 4  ;;  %s159_s25 = int_to_ptr.vmem [resolvable:$true] %s158_s25 }
   0xb   : > { %p406_p6 = scmp.ge.s32.totalorder %s650_s17, 2  ;;  %s653_s26 = smov 64  }
   0xc   : > { %p436_p4 = pneg %p715_p3  ;;  %s654_s27 = smov 4  }
   0xd   : > { %s402_s28 = sadd.s32 4294967294, %s650_s17   ;;  %s29_s29 = sadd.s32 1, %s646_s16 }
   0xe   : > { %p437_p5 = pnand %p436_p4, %p707_p1  ;;  %s39_s30 = sadd.s32 1, %s638_s14 }
   0xf   : > { %p30_p7 = scmp.ge.s32.totalorder %s29_s29, 2  ;;  %p46_p8 = scmp.ne.s32.totalorder %s638_s14, %s634_s13 }
  0x10   : > { %439 = dma.hbm_to_vmem [thread:$0]  (!%p437_p5), %s157_s22, 256, %s159_s25, [#allocation6], %s653_s26, %s653_s26, %s654_s27  }
  0x11   : > { %p47_p9 = scmp.eq.s32.totalorder %s650_s17, 0  ;;  %p52_p10 = scmp.ne.s32.totalorder %s634_s13, %s630_s12 }
  0x12   : > { %s837_s29 = smov (%p30_p7, %s29_s29), 0  ;;  %p130_p13 = scmp.eq.s32.totalorder %s401_s18, 1 }
  0x13   : > { %p734_p11 = por %p47_p9, %p46_p8  ;;  %p740_p12 = por %p707_p1, %p52_p10 }
  0x14   : > { %s36_s6 = ssub.s32 %s646_s16, %s837_s29  ;;  %p136_p2 = scmp.eq.s32.totalorder %s402_s28, 1 }
  0x15   : > { %p37_p0 = scmp.eq.s32.totalorder %s36_s6, 0  ;;  %p746_p4 = por %p130_p13, %p46_p8 }
  0x16   : > { %p449_p5 = scmp.lt.s32.totalorder %s650_s17, 2  ;;  %p754_p7 = por %p136_p2, %p52_p10 }
  0x17   : > { %s752_s8 = scalar_select %p37_p0, %s638_s14, %s39_s30  }
  0x18   : > { %s178_s10 = sand.u32 1, %s638_s14   ;;  %s408_s20 = sshll.u32 %s646_s16, 3 }
  0x19   : > { %s407_s11 = sshll.u32 %s178_s10, 3  ;;  %s186_s18 = scalar_lea.hbm %s821_s0, %s408_s20 }
  0x1a   : > { %s182_s24 = scalar_lea.vmem [#allocation2], %s407_s11  ;;  %s188_s26 = sshll.u32 %s186_s18, 4  ;;  %s189_s26 = int_to_ptr.hbm [resolvable:$true] %s188_s26 }
  0x1b   : > { %s190_s25 = sshll.u32 %s182_s24, 4  ;;  %p441_p8 = pnand %p449_p5, %p734_p11  ;;  %s191_s25 = int_to_ptr.vmem [resolvable:$true] %s190_s25 }
  0x1c   : > { %s179_s27 = scalar_lea.sflag [#allocation3], %s178_s10  ;;  %199 = sbr.rel (%p715_p3) target bundleno = 178 (0xb2), region = 32 }
  0x1d   : > { %443 = dma.hbm_to_vmem [thread:$0]  (!%p441_p8), %s189_s26, 128, %s191_s25, %s179_s27  }
  0x1e   : > { %s768_s28 = sand.u32 (!%p715_p3), 1, %s634_s13  }
  0x1f   : > { %s410_s30 = sshll.u32 (!%p715_p3), %s768_s28, 3  ;;  %s202_s6 = scalar_lea.sflag (!%p715_p3), [#allocation3], %s768_s28 }
  0x20   : > { %s205_s11 = scalar_lea.vmem (!%p715_p3), [#allocation2], %s410_s30 }
  0x21   : > { %617 = dma.done.wait (%p740_p12), %s202_s6, 128  }
  0x22   : > { %619 = vsyncadd (%p740_p12), %s202_s6, 4294967168 }
  0x23   : > { %621 = dma.done.wait (%p707_p1), [#allocation6], 256  }
  0x24   : > { %623 = vsyncadd (%p707_p1), [#allocation6], 4294967040  ;;  %v427_v0 = vld [vmem:[#allocation5 + $0x8] sm:$0xff]  ;;  %v426_v1 = vld [vmem:[#allocation5] sm:$0xff]  ;;  %vm263_vm0 = vcmask 261120   ;;  %s423_s23 = sshll.u32 %s642_s15, 3 }
  0x25   : > { %273 = vmatpush.bf16.msra.mxu0 %v427_v0  ;;  %v241_v2 = vld [vmem:[%s205_s11] sm:$0xff]  ;;  %s293_s10 = scalar_lea.hbm %s824_s3, %s423_s23  ;;  %s236_s19 = scalar_lea.vmem [#allocation7], %s410_s30 }
  0x26   : > { %v242_v3 = vpack.c.bf16 %v241_v2, %v241_v2  ;;  %v503_v4 = vld [vmem:[%s823_s2] ss:$0 sm:$0xff]  ;;  %s295_s22 = sshll.u32 %s236_s19, 4  ;;  %s297_s18 = sshll.u32 %s293_s10, 4  ;;  %s296_s22 = int_to_ptr.vmem [resolvable:$true] %s295_s22  ;;  %s298_s18 = int_to_ptr.hbm [resolvable:$true] %s297_s18 }
  0x27   : > { %s282_s24 = scalar_lea.sflag [#allocation4], %s768_s28  ;;  %s578_s25 = sshra.s32 %s298_s18, 4  ;;  %s579_s25 = int_to_ptr.hbm [resolvable:$true] %s578_s25 }
  0x28   : > { %s580_s15 = scalar_lea.hbm %s579_s25, 8  ;;  %s584_s6 = scalar_lea.hbm %s824_s3, 16 }
  0x29   : > { %274 = vmatpush.bf16.msra.mxu0 %v426_v1  ;;  %p581_p1 = scmp.ne.s32.totalorder %s579_s25, %s580_s15  ;;  %p585_p10 = scmp.lt.s32.totalorder %s579_s25, %s824_s3 }
  0x2a   : > { %p586_p11 = scmp.lt.s32.totalorder %s584_s6, %s580_s15 }
  0x2b   : > { %p582_p3 = pnand %p581_p1, %p746_p4 }
  0x2c   : > { %421 = vmatmul.msk.bf16.vlgmr.msra.gmra.mxu0 %vm263_vm0, %v242_v3  ;;  %p587_p12 = por %p586_p11, %p585_p10 }
  0x2d   : > { %p583_p9 = pneg %p582_p3 }
  0x2f   : > { %p588_p13 = pnand %p587_p12, %p583_p9 }
  0xa9   : > { %v276_v5 = vpop.f32.mrf.mxu0 }
  0xaa   : > { %v277_v6 = vadd.f32 %v503_v4, %v276_v5 }
  0xac   : > { %280 = vst [vmem:[%s236_s19] sm:$0xff] %v277_v6 }
  0xad   : > { %591 = shalt.err (!%p588_p13)
}
  0xae   : > { %434 = dma.vmem_to_hbm [thread:$0]  (%p746_p4), %s296_s22, 128, %s298_s18, %s282_s24  }
  0xb1   : > { %v278_v7 = vpop.f32.mrf.mxu0 }
  0xb2 PF: > { %s309_s28 = sand.u32 1, %s630_s12   ;;  %p445_p0 = pnand %p406_p6, %p754_p7 }
  0xb3   : > { %s310_s23 = scalar_lea.sflag [#allocation4], %s309_s28 }
  0xb4   : > { %p446_p2 = pneg %p445_p0 }
  0xb6   : > { %625 = dma.done.wait (%p446_p2), %s310_s23, 128  }
  0xb7   : > { %627 = vsyncadd (%p446_p2), %s310_s23, 4294967168  ;;  %s20_s17 = sadd.s32 1, %s650_s17   ;;  %s831_s12 = smov %s634_s13 }
  0xb8   : > { %p17_p5 = scmp.ge.s32.totalorder %s20_s17, 4   ;;  %s832_s13 = smov %s638_s14 }
  0xb9   : > { %s833_s14 = smov %s752_s8  ;;  %s834_s15 = smov %s646_s16 }
  0xba   : > { %s835_s16 = smov %s837_s29  ;;  %19 = sbr.rel (!%p17_p5) target bundleno = 7 (0x7), region = 85 }
  0xbf   :  { %316 = vsyncpa [#allocation3], 1 }
  0xc0   :  { %318 = vsyncpa [#allocation3 + $0x1], 1 }
  0xc1   :  { %319 = vsyncpa [#allocation6], 1 }
  0xc2   :  { %320 = vsyncpa [#allocation4], 1 }
  0xc3   :  { %322 = vsyncpa [#allocation4 + $0x1], 1 }

</bundles_post_ra>
